<compile_context>
chip_gen: v7x
topology: tpu7x:2x2x1
jax: 0.10.0
libtpu: 0.0.40
codegen_flags: <defaults>
</compile_context>

<pallas_src>
import functools

import jax
import jax.numpy as jnp
from jax.experimental import pallas as pl
from jax.experimental.pallas import tpu as pltpu

EPS = 1e-5  # nn.InstanceNorm2d default eps, affine=False


def _convblock_kernel(x_ref, w_ref, mask_ref, o_ref, *, K, wp, out_flat, inv_hw, eps):
    # x_ref:    (1, C_in, LPAD)       flat reflect-padded sample (row stride wp)
    # w_ref:    (K*K, C_out, C_in)    per-tap weight matrices
    # mask_ref: (1, out_flat)         1.0 on real output columns, 0.0 on pad cols
    # o_ref:    (1, C_out, out_flat)  conv + instnorm + relu, padded-width rows
    x = x_ref[0]                                     # (C_in, LPAD)

    c_out = w_ref.shape[1]
    acc = jnp.zeros((c_out, out_flat), dtype=jnp.float32)
    # K*K shifted matmuls == in-VMEM "im2col"; slices are static lane offsets.
    for t in range(K * K):
        ki, kj = divmod(t, K)
        off = ki * wp + kj
        x_tap = x[:, off:off + out_flat]             # (C_in, out_flat) shifted view
        acc = acc + jnp.dot(w_ref[t], x_tap, preferred_element_type=jnp.float32)

    # InstanceNorm2d (affine=False): per-channel stats over valid spatial
    # positions only (mask zeroes the Wp-W scrap columns); biased variance,
    # single pass: var = E[y^2] - mean^2, all in f32.
    m = mask_ref[...]                                # (1, out_flat)
    masked = acc * m
    mean = jnp.sum(masked, axis=1, keepdims=True) * inv_hw          # (C_out, 1)
    ex2 = jnp.sum(masked * acc, axis=1, keepdims=True) * inv_hw     # E[y^2]
    var = jnp.maximum(ex2 - mean * mean, 0.0)
    y = (acc - mean) * jax.lax.rsqrt(var + eps)

    # ReLU (use_act=True); scrap columns get written too and are trimmed outside.
    o_ref[0] = jnp.maximum(y, 0.0).astype(o_ref.dtype)


def conv_block_forward(x_nchw, weight, bias=None, *, kernel_size=3, padding=1,
                       compute_dtype=jnp.float32):
    """ConvBlock(down=True, use_act=True): Conv2d(k, s=1, p=(k-1)//2, reflect)
    -> InstanceNorm2d(affine=False) -> ReLU.

    `bias` is accepted for API parity but unused: InstanceNorm's mean
    subtraction cancels a constant per-channel bias exactly (dead work)."""
    del bias
    N, C_in, H, W = x_nchw.shape
    C_out = weight.shape[0]
    K = kernel_size
    P = padding
    assert weight.shape == (C_out, C_in, K, K)
    assert P == (K - 1) // 2, "stride-1 'same' conv assumed"

    Hp, Wp = H + 2 * P, W + 2 * P
    out_flat = H * Wp                     # padded-width output rows; cols >= W are scrap
    # flat slab length: worst tap slice starts at (K-1)*Wp+(K-1) with length out_flat
    lpad = (K - 1) * Wp + (K - 1) + out_flat
    lpad = ((max(lpad, Hp * Wp) + 127) // 128) * 128   # lane-pad to a 128 multiple

    # Reflect pad once, flatten spatial (row stride Wp), zero-pad the tail.
    xp = jnp.pad(x_nchw, ((0, 0), (0, 0), (P, P), (P, P)), mode="reflect")
    xflat = xp.reshape(N, C_in, Hp * Wp).astype(compute_dtype)
    xflat = jnp.pad(xflat, ((0, 0), (0, 0), (0, lpad - Hp * Wp)))

    # Per-tap (C_out, C_in) weight matrices, tap-major (ki, kj).
    w_taps = jnp.transpose(weight, (2, 3, 0, 1)).reshape(K * K, C_out, C_in)
    w_taps = w_taps.astype(compute_dtype)

    # Validity mask over the padded-width flat spatial grid.
    col = jnp.arange(out_flat, dtype=jnp.int32) % Wp
    colmask = (col < W).astype(jnp.float32).reshape(1, out_flat)

    kernel = functools.partial(
        _convblock_kernel, K=K, wp=Wp, out_flat=out_flat,
        inv_hw=1.0 / float(H * W), eps=EPS)

    out = pl.pallas_call(
        kernel,
        out_shape=jax.ShapeDtypeStruct((N, C_out, out_flat), jnp.float32),
        grid_spec=pltpu.PrefetchScalarGridSpec(
            num_scalar_prefetch=0,
            grid=(N,),
            in_specs=[
                pl.BlockSpec((1, C_in, lpad), lambda n: (n, 0, 0)),
                pl.BlockSpec((K * K, C_out, C_in), lambda n: (0, 0, 0)),
                pl.BlockSpec((1, out_flat), lambda n: (0, 0)),
            ],
            out_specs=pl.BlockSpec((1, C_out, out_flat), lambda n: (n, 0, 0)),
        ),
        compiler_params=pltpu.CompilerParams(
            dimension_semantics=("parallel",),
            vmem_limit_bytes=32 * 1024 * 1024,
        ),
    )(xflat, w_taps, colmask)

    # Padded-width -> NCHW: trim the scrap columns per row (no transpose needed).
    return out.reshape(N, C_out, H, Wp)[:, :, :, :W]


def reference_forward(x_nchw, weight, bias, *, kernel_size=3, padding=1):
    """Pure-JAX reference matching the PyTorch module (includes the conv bias)."""
    xp = jnp.pad(
        x_nchw, ((0, 0), (0, 0), (padding, padding), (padding, padding)),
        mode="reflect",
    )
    y = jax.lax.conv_general_dilated(
        xp, weight, window_strides=(1, 1), padding="VALID",
        dimension_numbers=("NCHW", "OIHW", "NCHW"),
    ) + bias.reshape(1, -1, 1, 1)
    mean = jnp.mean(y, axis=(2, 3), keepdims=True)
    var = jnp.mean((y - mean) ** 2, axis=(2, 3), keepdims=True)
    return jnp.maximum((y - mean) * jax.lax.rsqrt(var + EPS), 0.0)


if __name__ == "__main__":
    key = jax.random.PRNGKey(0)
    k1, k2, k3 = jax.random.split(key, 3)

    N, C_in, H, W = 2, 4, 16, 16
    C_out, K = 8, 3

    x = jax.random.normal(k1, (N, C_in, H, W), dtype=jnp.float32)
    # Conv2d params: weight (C_out, C_in, K, K), bias (C_out,)
    weight = 0.1 * jax.random.normal(k2, (C_out, C_in, K, K), dtype=jnp.float32)
    bias = 0.1 * jax.random.normal(k3, (C_out,), dtype=jnp.float32)

    out = conv_block_forward(x, weight, bias)
    out = jax.block_until_ready(out)

    ref = reference_forward(x, weight, bias)
    assert out.shape == (N, C_out, H, W)
    assert jnp.max(jnp.abs(out - ref)) < 2e-4

    print("KERNEL_OK")
</pallas_src>

<mosaic_0001>
module attributes {stable_mosaic.version = 11 : i64} {
  func.func @_convblock_kernel(%arg0: i32, %arg1: memref<1x4x384xf32, #tpu.memory_space<vmem>>, %arg2: memref<9x8x4xf32, #tpu.memory_space<vmem>>, %arg3: memref<1x288xf32, #tpu.memory_space<vmem>>, %arg4: memref<1x8x288xf32, #tpu.memory_space<vmem>>) attributes {dimension_semantics = [#tpu.dimension_semantics<parallel>], iteration_bounds = array<i64: 2>, scalar_prefetch = 0 : i64, scratch_operands = 0 : i64, tpu.core_type = #tpu.core_type<tc>, window_params = [{transform_indices = @transform_0, window_bounds = array<i64: 1, 4, 384>}, {pipeline_mode = #tpu.pipeline_mode<synchronous>, transform_indices = @transform_1, window_bounds = array<i64: 9, 8, 4>}, {pipeline_mode = #tpu.pipeline_mode<synchronous>, transform_indices = @transform_2, window_bounds = array<i64: 1, 288>}, {transform_indices = @transform_3, window_bounds = array<i64: 1, 8, 288>}]} {
    %c0 = arith.constant 0 : index
    %c0_0 = arith.constant 0 : index
    %c0_1 = arith.constant 0 : index
    %0 = vector.load %arg1[%c0, %c0_0, %c0_1] : memref<1x4x384xf32, #tpu.memory_space<vmem>>, vector<1x4x384xf32>
    %1 = vector.shape_cast %0 : vector<1x4x384xf32> to vector<4x384xf32>
    %cst = arith.constant 0.000000e+00 : f32
    %2 = vector.broadcast %cst : f32 to vector<8x288xf32>
    %3 = vector.extract_strided_slice %1 {offsets = [0, 0], sizes = [4, 288], strides = [1, 1]} : vector<4x384xf32> to vector<4x288xf32>
    %c0_2 = arith.constant 0 : index
    %c0_3 = arith.constant 0 : index
    %c0_4 = arith.constant 0 : index
    %4 = vector.load %arg2[%c0_2, %c0_3, %c0_4] : memref<9x8x4xf32, #tpu.memory_space<vmem>>, vector<1x8x4xf32>
    %5 = vector.shape_cast %4 : vector<1x8x4xf32> to vector<8x4xf32>
    %cst_5 = arith.constant dense<0.000000e+00> : vector<8x288xf32>
    %6 = tpu.matmul %5, %3, %cst_5 {dimension_numbers = #tpu.dot_dimension_numbers<[1], [0], [0], [1], [0, 0, 1, 1], [], []>} : vector<8x4xf32>, vector<4x288xf32>, vector<8x288xf32> -> vector<8x288xf32>
    %7 = arith.addf %2, %6 : vector<8x288xf32>
    %8 = vector.extract_strided_slice %1 {offsets = [0, 1], sizes = [4, 288], strides = [1, 1]} : vector<4x384xf32> to vector<4x288xf32>
    %c1 = arith.constant 1 : index
    %c0_6 = arith.constant 0 : index
    %c0_7 = arith.constant 0 : index
    %9 = vector.load %arg2[%c1, %c0_6, %c0_7] : memref<9x8x4xf32, #tpu.memory_space<vmem>>, vector<1x8x4xf32>
    %10 = vector.shape_cast %9 : vector<1x8x4xf32> to vector<8x4xf32>
    %cst_8 = arith.constant dense<0.000000e+00> : vector<8x288xf32>
    %11 = tpu.matmul %10, %8, %cst_8 {dimension_numbers = #tpu.dot_dimension_numbers<[1], [0], [0], [1], [0, 0, 1, 1], [], []>} : vector<8x4xf32>, vector<4x288xf32>, vector<8x288xf32> -> vector<8x288xf32>
    %12 = arith.addf %7, %11 : vector<8x288xf32>
    %13 = vector.extract_strided_slice %1 {offsets = [0, 2], sizes = [4, 288], strides = [1, 1]} : vector<4x384xf32> to vector<4x288xf32>
    %c2 = arith.constant 2 : index
    %c0_9 = arith.constant 0 : index
    %c0_10 = arith.constant 0 : index
    %14 = vector.load %arg2[%c2, %c0_9, %c0_10] : memref<9x8x4xf32, #tpu.memory_space<vmem>>, vector<1x8x4xf32>
    %15 = vector.shape_cast %14 : vector<1x8x4xf32> to vector<8x4xf32>
    %cst_11 = arith.constant dense<0.000000e+00> : vector<8x288xf32>
    %16 = tpu.matmul %15, %13, %cst_11 {dimension_numbers = #tpu.dot_dimension_numbers<[1], [0], [0], [1], [0, 0, 1, 1], [], []>} : vector<8x4xf32>, vector<4x288xf32>, vector<8x288xf32> -> vector<8x288xf32>
    %17 = arith.addf %12, %16 : vector<8x288xf32>
    %18 = vector.extract_strided_slice %1 {offsets = [0, 18], sizes = [4, 288], strides = [1, 1]} : vector<4x384xf32> to vector<4x288xf32>
    %c3 = arith.constant 3 : index
    %c0_12 = arith.constant 0 : index
    %c0_13 = arith.constant 0 : index
    %19 = vector.load %arg2[%c3, %c0_12, %c0_13] : memref<9x8x4xf32, #tpu.memory_space<vmem>>, vector<1x8x4xf32>
    %20 = vector.shape_cast %19 : vector<1x8x4xf32> to vector<8x4xf32>
    %cst_14 = arith.constant dense<0.000000e+00> : vector<8x288xf32>
    %21 = tpu.matmul %20, %18, %cst_14 {dimension_numbers = #tpu.dot_dimension_numbers<[1], [0], [0], [1], [0, 0, 1, 1], [], []>} : vector<8x4xf32>, vector<4x288xf32>, vector<8x288xf32> -> vector<8x288xf32>
    %22 = arith.addf %17, %21 : vector<8x288xf32>
    %23 = vector.extract_strided_slice %1 {offsets = [0, 19], sizes = [4, 288], strides = [1, 1]} : vector<4x384xf32> to vector<4x288xf32>
    %c4 = arith.constant 4 : index
    %c0_15 = arith.constant 0 : index
    %c0_16 = arith.constant 0 : index
    %24 = vector.load %arg2[%c4, %c0_15, %c0_16] : memref<9x8x4xf32, #tpu.memory_space<vmem>>, vector<1x8x4xf32>
    %25 = vector.shape_cast %24 : vector<1x8x4xf32> to vector<8x4xf32>
    %cst_17 = arith.constant dense<0.000000e+00> : vector<8x288xf32>
    %26 = tpu.matmul %25, %23, %cst_17 {dimension_numbers = #tpu.dot_dimension_numbers<[1], [0], [0], [1], [0, 0, 1, 1], [], []>} : vector<8x4xf32>, vector<4x288xf32>, vector<8x288xf32> -> vector<8x288xf32>
    %27 = arith.addf %22, %26 : vector<8x288xf32>
    %28 = vector.extract_strided_slice %1 {offsets = [0, 20], sizes = [4, 288], strides = [1, 1]} : vector<4x384xf32> to vector<4x288xf32>
    %c5 = arith.constant 5 : index
    %c0_18 = arith.constant 0 : index
    %c0_19 = arith.constant 0 : index
    %29 = vector.load %arg2[%c5, %c0_18, %c0_19] : memref<9x8x4xf32, #tpu.memory_space<vmem>>, vector<1x8x4xf32>
    %30 = vector.shape_cast %29 : vector<1x8x4xf32> to vector<8x4xf32>
    %cst_20 = arith.constant dense<0.000000e+00> : vector<8x288xf32>
    %31 = tpu.matmul %30, %28, %cst_20 {dimension_numbers = #tpu.dot_dimension_numbers<[1], [0], [0], [1], [0, 0, 1, 1], [], []>} : vector<8x4xf32>, vector<4x288xf32>, vector<8x288xf32> -> vector<8x288xf32>
    %32 = arith.addf %27, %31 : vector<8x288xf32>
    %33 = vector.extract_strided_slice %1 {offsets = [0, 36], sizes = [4, 288], strides = [1, 1]} : vector<4x384xf32> to vector<4x288xf32>
    %c6 = arith.constant 6 : index
    %c0_21 = arith.constant 0 : index
    %c0_22 = arith.constant 0 : index
    %34 = vector.load %arg2[%c6, %c0_21, %c0_22] : memref<9x8x4xf32, #tpu.memory_space<vmem>>, vector<1x8x4xf32>
    %35 = vector.shape_cast %34 : vector<1x8x4xf32> to vector<8x4xf32>
    %cst_23 = arith.constant dense<0.000000e+00> : vector<8x288xf32>
    %36 = tpu.matmul %35, %33, %cst_23 {dimension_numbers = #tpu.dot_dimension_numbers<[1], [0], [0], [1], [0, 0, 1, 1], [], []>} : vector<8x4xf32>, vector<4x288xf32>, vector<8x288xf32> -> vector<8x288xf32>
    %37 = arith.addf %32, %36 : vector<8x288xf32>
    %38 = vector.extract_strided_slice %1 {offsets = [0, 37], sizes = [4, 288], strides = [1, 1]} : vector<4x384xf32> to vector<4x288xf32>
    %c7 = arith.constant 7 : index
    %c0_24 = arith.constant 0 : index
    %c0_25 = arith.constant 0 : index
    %39 = vector.load %arg2[%c7, %c0_24, %c0_25] : memref<9x8x4xf32, #tpu.memory_space<vmem>>, vector<1x8x4xf32>
    %40 = vector.shape_cast %39 : vector<1x8x4xf32> to vector<8x4xf32>
    %cst_26 = arith.constant dense<0.000000e+00> : vector<8x288xf32>
    %41 = tpu.matmul %40, %38, %cst_26 {dimension_numbers = #tpu.dot_dimension_numbers<[1], [0], [0], [1], [0, 0, 1, 1], [], []>} : vector<8x4xf32>, vector<4x288xf32>, vector<8x288xf32> -> vector<8x288xf32>
    %42 = arith.addf %37, %41 : vector<8x288xf32>
    %43 = vector.extract_strided_slice %1 {offsets = [0, 38], sizes = [4, 288], strides = [1, 1]} : vector<4x384xf32> to vector<4x288xf32>
    %c8 = arith.constant 8 : index
    %c0_27 = arith.constant 0 : index
    %c0_28 = arith.constant 0 : index
    %44 = vector.load %arg2[%c8, %c0_27, %c0_28] : memref<9x8x4xf32, #tpu.memory_space<vmem>>, vector<1x8x4xf32>
    %45 = vector.shape_cast %44 : vector<1x8x4xf32> to vector<8x4xf32>
    %cst_29 = arith.constant dense<0.000000e+00> : vector<8x288xf32>
    %46 = tpu.matmul %45, %43, %cst_29 {dimension_numbers = #tpu.dot_dimension_numbers<[1], [0], [0], [1], [0, 0, 1, 1], [], []>} : vector<8x4xf32>, vector<4x288xf32>, vector<8x288xf32> -> vector<8x288xf32>
    %47 = arith.addf %42, %46 : vector<8x288xf32>
    %c0_30 = arith.constant 0 : index
    %c0_31 = arith.constant 0 : index
    %48 = vector.load %arg3[%c0_30, %c0_31] : memref<1x288xf32, #tpu.memory_space<vmem>>, vector<1x288xf32>
    %49 = vector.broadcast %48 : vector<1x288xf32> to vector<8x288xf32>
    %50 = arith.mulf %47, %49 : vector<8x288xf32>
    %cst_32 = arith.constant dense<0.000000e+00> : vector<8xf32>
    %51 = vector.multi_reduction <add>, %50, %cst_32 [1] : vector<8x288xf32> to vector<8xf32>
    %52 = vector.shape_cast %51 : vector<8xf32> to vector<8x1xf32>
    %cst_33 = arith.constant 3.906250e-03 : f32
    %53 = vector.broadcast %cst_33 : f32 to vector<8x1xf32>
    %54 = arith.mulf %52, %53 : vector<8x1xf32>
    %55 = arith.mulf %50, %47 : vector<8x288xf32>
    %cst_34 = arith.constant dense<0.000000e+00> : vector<8xf32>
    %56 = vector.multi_reduction <add>, %55, %cst_34 [1] : vector<8x288xf32> to vector<8xf32>
    %57 = vector.shape_cast %56 : vector<8xf32> to vector<8x1xf32>
    %cst_35 = arith.constant 3.906250e-03 : f32
    %58 = vector.broadcast %cst_35 : f32 to vector<8x1xf32>
    %59 = arith.mulf %57, %58 : vector<8x1xf32>
    %60 = arith.mulf %54, %54 : vector<8x1xf32>
    %61 = arith.subf %59, %60 : vector<8x1xf32>
    %cst_36 = arith.constant 0.000000e+00 : f32
    %62 = vector.broadcast %cst_36 : f32 to vector<8x1xf32>
    %63 = arith.maximumf %61, %62 : vector<8x1xf32>
    %64 = vector.broadcast %54 : vector<8x1xf32> to vector<8x288xf32>
    %65 = arith.subf %47, %64 : vector<8x288xf32>
    %cst_37 = arith.constant 9.99999974E-6 : f32
    %66 = vector.broadcast %cst_37 : f32 to vector<8x1xf32>
    %67 = arith.addf %63, %66 : vector<8x1xf32>
    %68 = math.rsqrt %67 : vector<8x1xf32>
    %69 = vector.broadcast %68 : vector<8x1xf32> to vector<8x288xf32>
    %70 = arith.mulf %65, %69 : vector<8x288xf32>
    %cst_38 = arith.constant 0.000000e+00 : f32
    %71 = vector.broadcast %cst_38 : f32 to vector<8x288xf32>
    %72 = arith.maximumf %70, %71 : vector<8x288xf32>
    %c0_39 = arith.constant 0 : index
    %c0_40 = arith.constant 0 : index
    %c0_41 = arith.constant 0 : index
    %73 = vector.load %arg4[%c0_39, %c0_40, %c0_41] : memref<1x8x288xf32, #tpu.memory_space<vmem>>, vector<1x8x288xf32>
    %74 = vector.shape_cast %73 : vector<1x8x288xf32> to vector<8x288xf32>
    %75 = vector.shape_cast %72 : vector<8x288xf32> to vector<1x8x288xf32>
    tpu.vector_store %arg4[%c0_39, %c0_40, %c0_41], %75 {strides = array<i32>} : memref<1x8x288xf32, #tpu.memory_space<vmem>>, vector<1x8x288xf32>,
    return
  }
  func.func @transform_0(%arg0: i32) -> (i32, i32, i32) {
    %c0_i32 = arith.constant 0 : i32
    %c0_i32_0 = arith.constant 0 : i32
    %c0_i32_1 = arith.constant 0 : i32
    return %arg0, %c0_i32, %c0_i32_0 : i32, i32, i32
  }
  func.func @transform_1(%arg0: i32) -> (i32, i32, i32) {
    %c0_i32 = arith.constant 0 : i32
    %c0_i32_0 = arith.constant 0 : i32
    %c0_i32_1 = arith.constant 0 : i32
    %c0_i32_2 = arith.constant 0 : i32
    return %c0_i32, %c0_i32_0, %c0_i32_1 : i32, i32, i32
  }
  func.func @transform_2(%arg0: i32) -> (i32, i32) {
    %c0_i32 = arith.constant 0 : i32
    %c0_i32_0 = arith.constant 0 : i32
    %c0_i32_1 = arith.constant 0 : i32
    return %c0_i32, %c0_i32_0 : i32, i32
  }
  func.func @transform_3(%arg0: i32) -> (i32, i32, i32) {
    %c0_i32 = arith.constant 0 : i32
    %c0_i32_0 = arith.constant 0 : i32
    %c0_i32_1 = arith.constant 0 : i32
    return %arg0, %c0_i32, %c0_i32_0 : i32, i32, i32
  }
}

</mosaic_0001>

<bundles_post_ra>
// kernel: tpu_custom_call.1
= control target key start
LH: loop header
LB: loop body
LE: loop exit
PB: predicated region body
PF: predicated region fallthrough
CT: control target
= control target key end

     0   :  { %8 = vsyncpa [#allocation3], 0  ;;  %s2295_s0 = inlined_call_operand.vmem [shape: f32[2,4,384], index: 0, kind: input, shape index: {}]   ;;  %s2296_s1 = inlined_call_operand.vmem [shape: f32[9,8,4], index: 1, kind: input, shape index: {}]   ;;  %s2297_s2 = inlined_call_operand.vmem [shape: f32[1,288], index: 2, kind: input, shape index: {}]   ;;  %s2298_s3 = inlined_call_operand.hbm [shape: f32[2,8,288], index: 3, kind: output, shape index: {}]  }
   0x1   :  { %10 = vsyncpa [#allocation3 + $0x1], 0  ;;  %s2069_s12 = smov 0   ;;  %s2071_s13 = smov 0  }
   0x2   :  { %s2073_s14 = smov 0   ;;  %s2075_s15 = smov 0  }
   0x3 LB: > { %s2090_s16 = sadd.s32 4294967295, %s2036_s15   ;;  %s1763_s17 = sadd.s32 4294967294, %s2036_s15   ;;  %s2036_s15 = sphi %s2075_s15, %s2304_s15   ;;  %s2032_s14 = sphi %s2073_s14, %s2303_s14   ;;  %s2028_s13 = sphi %s2071_s13, %s2302_s13   ;;  %s2024_s12 = sphi %s2069_s12, %s2301_s12  }
   0x4   : > { %s2094_s18 = sadd.s32 1, %s2036_s15   ;;  %s91_s19 = sadd.s32 1, %s2032_s14 }
   0x5   : > { %s88_s20 = ssub.s32 %s2036_s15, %s2094_s18  ;;  %p101_p0 = scmp.ne.s32.totalorder %s2032_s14, %s2028_s13 }
   0x6   : > { %p89_p1 = scmp.eq.s32.totalorder %s88_s20, 0  ;;  %p102_p2 = scmp.eq.s32.totalorder %s2090_s16, 1 }
   0x7   : > { %p107_p3 = scmp.ne.s32.totalorder %s2028_s13, %s2024_s12  ;;  %p108_p4 = scmp.eq.s32.totalorder %s1763_s17, 1 }
   0x8   : > { %s2105_s21 = scalar_select %p89_p1, %s2032_s14, %s91_s19  }
   0x9   : > { %p2107_p5 = por %p102_p2, %p101_p0  ;;  %p2111_p6 = por %p108_p4, %p107_p3 }
   0xa   : > { %p1766_p7 = scmp.ge.s32.totalorder %s2036_s15, 1  ;;  %p140_p8 = scmp.lt.s32.totalorder %s2036_s15, 3 }
   0xc   : > { %p141_p9 = pnand %p1766_p7, %p140_p8 }
   0xd   : > { %p164_p10 = scmp.lt.s32.totalorder (!%p141_p9), %s2090_s16, 1  ;;  %v2038_v0 = vmov (!%p141_p9), 0.0   ;;  %vm2039_vm0 = vmmov (!%p141_p9), 0   ;;  %s2040_s29 = smov (!%p141_p9), 127   ;;  %vm190_vm1 = vcmask (!%p141_p9), 1043456   ;;  %vm183_vm2 = vcmask (!%p141_p9), 1039360  }
   0xe   : > { %144 = sbr.rel (%p141_p9) target bundleno = 616 (0x268), region = 32  ;;  %1842 = vmatprep.subr.mxu1 (!%p141_p9), %v2038_v0  ;;  %1844 = vmatprep.mubr.msk.f32.mxu1 (!%p141_p9), %vm2039_vm0, %v2038_v0  ;;  %s2041_s30 = smov (!%p141_p9), 126   ;;  %v1768_v7 = vld [vmem:[%s2296_s1 + $0x8] sm:$0xff] (!%p141_p9)  ;;  %vm186_vm3 = vcmask (!%p141_p9), 31744   ;;  %vm496_vm4 = vcmask (!%p141_p9), 1031168   ;;  %v171_v14 = vld [vmem:[%s2296_s1] sm:$0xff] (!%p141_p9)  ;;  %v1638_v53 = vlaneseq (!%p141_p9) }
   0xf   : > { %261 = vmatprep.mubr.f32.mxu0 (!%p141_p9), %v2038_v0  ;;  %s2042_s4 = smov (!%p141_p9), 110   ;;  %s2043_s5 = smov (!%p141_p9), 109   ;;  %vm660_vm5 = vcmask (!%p141_p9), 900096   ;;  %v1779_v21 = vld [vmem:[%s2296_s1 + $0x10] sm:$0xff] (!%p141_p9)  ;;  %vm824_vm6 = vcmask (!%p141_p9), 891904   ;;  %v1785_v27 = vld [vmem:[%s2296_s1 + $0x18] sm:$0xff] (!%p141_p9) }
  0x10   : > { %s2044_s6 = smov (!%p141_p9), 108   ;;  %s2045_s7 = smov (!%p141_p9), 92   ;;  %vm988_vm7 = vcmask (!%p141_p9), 883712   ;;  %v1791_v33 = vld [vmem:[%s2296_s1 + $0x20] sm:$0xff] (!%p141_p9)  ;;  %vm1152_vm8 = vcmask (!%p141_p9), 752640   ;;  %v1797_v39 = vld [vmem:[%s2296_s1 + $0x28] sm:$0xff] (!%p141_p9) }
  0x11   : > { %s2046_s8 = smov (!%p141_p9), 91   ;;  %s2047_s9 = smov (!%p141_p9), 90   ;;  %vm1316_vm9 = vcmask (!%p141_p9), 744448   ;;  %v1803_v44 = vld [vmem:[%s2296_s1 + $0x30] sm:$0xff] (!%p141_p9)  ;;  %vm1480_vm10 = vcmask (!%p141_p9), 736256   ;;  %v1809_v50 = vld [vmem:[%s2296_s1 + $0x38] sm:$0xff] (!%p141_p9) }
  0x12   : > { %v1815_v52 = vld [vmem:[%s2296_s1 + $0x40] sm:$0xff] (!%p141_p9)  ;;  %v1639_v54 = vshrl.u32 (!%p141_p9), %v1638_v53, 7  ;;  %vm1657_vm11 = vcmask (!%p141_p9), 261120   ;;  %s161_s17 = sand.u32 (!%p141_p9), 1, %s2028_s13   ;;  %s1921_s20 = smul.u32 (!%p141_p9), 384, %s2090_s16 }
  0x13   : > { %v1636_v56 = vld [vmem:[%s2297_s2] sm:$0x7] (!%p141_p9)  ;;  %s1919_s19 = smul.u32 (!%p141_p9), 24, %s161_s17 }
  0x14   : > { %v1648_v55 = vsub.s32 (!%p141_p9), 2, %v1639_v54  ;;  %v1640_v57 = vsub.s32 (!%p141_p9), 0, %v1639_v54  ;;  %v1644_v58 = vsub.s32 (!%p141_p9), 1, %v1639_v54 }
  0x15   : > { %s165_s24 = scalar_select %p164_p10, %s2090_s16, 1 }
  0x16   : > { %v1649_v59 = vrot.slane %v1636_v56, %v1648_v55  ;;  %v1641_v60 = vrot.slane %v1636_v56, %v1640_v57  ;;  %v1645_v62 = vrot.slane %v1636_v56, %v1644_v58  ;;  %s1690_s16 = scalar_lea.sflag [#allocation3], %s161_s17 }
  0x17   : > { %s1920_s25 = smul.u32 12, %s165_s24  ;;  %s163_s24 = scalar_lea.vmem [#allocation2], %s1919_s19 }
  0x19   : > { %s168_s28 = scalar_lea.vmem %s2295_s0, %s1920_s25  ;;  %s1704_s25 = sshll.u32 %s163_s24, 4  ;;  %s2254_s25 = int_to_ptr.vmem [resolvable:$true] %s1704_s25 }
  0x1a   : > { %v169_v1 = vld [vmem:[%s168_s28] sm:$0xff]  ;;  %v170_v3 = vld [vmem:[%s168_s28 + $0x8] sm:$0xf]  ;;  %s2252_s28 = scalar_lea.hbm %s2298_s3, %s1921_s20 }
  0x1b   : > { %177 = vrot.lane.b32.xlu1 %v169_v1, %s2040_s29  ;;  %v176_v2 = vcombine.high %v169_v1, %v169_v1 }
  0x1d   : > { %179 = vrot.lane.b32.xlu0 %v176_v2, %s2040_s29 }
  0x1f   : > { %492 = vrot.lane.b32.xlu1 %v176_v2, %s2041_s30 }
  0x21   : > { %181 = vrot.lane.b32.xlu0 %v170_v3, %s2040_s29  ;;  %s1974_s29 = scalar_lea.vmem %s2254_s25, 384 }
  0x22   : > { %p1975_p11 = scmp.ne.s32.totalorder %s2254_s25, %s1974_s29 }
  0x23   : > { %490 = vrot.lane.b32.xlu1 %v169_v1, %s2041_s30 }
  0x24   : > { %p1976_p12 = pnand %p1975_p11, %p2107_p5 }
  0x25   : > { %494 = vrot.lane.b32.xlu0 %v170_v3, %s2041_s30  ;;  %s2048_s30 = smov [#allocation2]  }
  0x26   : > { %p1977_p13 = pneg %p1976_p12 }
  0x27   : > { %658 = vrot.lane.b32.xlu1 %v170_v3, %s2042_s4 }
  0x29   : > { %656 = vrot.lane.b32.xlu0 %v176_v2, %s2042_s4 }
  0x2b   : > { %820 = vrot.lane.b32.xlu1 %v176_v2, %s2043_s5 }
  0x2d   : > { %654 = vrot.lane.b32.xlu0 %v169_v1, %s2042_s4  ;;  %s1978_s4 = sshll.u32 %s2048_s30, 4  ;;  %s1979_s4 = int_to_ptr.vmem [resolvable:$false] %s1978_s4 }
  0x2e   : > { %p1981_p0 = scmp.lt.s32.totalorder %s2254_s25, %s1979_s4 }
  0x2f   : > { %818 = vrot.lane.b32.xlu1 %v169_v1, %s2043_s5 }
  0x31   : > { %822 = vrot.lane.b32.xlu0 %v170_v3, %s2043_s5  ;;  %s1980_s5 = scalar_lea.vmem %s1979_s4, 768 }
  0x32   : > { %p1982_p1 = scmp.lt.s32.totalorder %s1980_s5, %s1974_s29 }
  0x33   : > { %986 = vrot.lane.b32.xlu1 %v170_v3, %s2044_s6 }
  0x34   : > { %p1983_p2 = por %p1982_p1, %p1981_p0 }
  0x35   : > { %984 = vrot.lane.b32.xlu0 %v176_v2, %s2044_s6 }
  0x36   : > { %p1984_p3 = pnand %p1983_p2, %p1977_p13 }
  0x37   : > { %1148 = vrot.lane.b32.xlu1 %v176_v2, %s2045_s7 }
  0x39   : > { %982 = vrot.lane.b32.xlu0 %v169_v1, %s2044_s6 }
  0x3b   : > { %1146 = vrot.lane.b32.xlu1 %v169_v1, %s2045_s7 }
  0x3d   : > { %1150 = vrot.lane.b32.xlu0 %v170_v3, %s2045_s7 }
  0x3f   : > { %1314 = vrot.lane.b32.xlu1 %v170_v3, %s2046_s8 }
  0x41   : > { %1312 = vrot.lane.b32.xlu0 %v176_v2, %s2046_s8 }
  0x43   : > { %1476 = vrot.lane.b32.xlu1 %v176_v2, %s2047_s9 }
  0x45   : > { %1310 = vrot.lane.b32.xlu0 %v169_v1, %s2046_s8 }
  0x47   : > { %1474 = vrot.lane.b32.xlu1 %v169_v1, %s2047_s9 }
  0x49   : > { %1478 = vrot.lane.b32.xlu0 %v170_v3, %s2047_s9 }
  0x8d   : > { %v178_v4 = vpop.permute.xlu1 %177 }
  0x8f   : > { %v180_v5 = vpop.permute.xlu0 %179 }
  0x90   : > { %v184_v10 = vsel %vm183_vm2, %v178_v4, %v180_v5 }
  0x91   : > { %v493_v6 = vpop.permute.xlu1 %492 }
  0x93   : > { %v182_v8 = vpop.permute.xlu0 %181 }
  0x94   : > { %1843 = vmatpush3.msk.msra.mxu1 %vm190_vm1, %v182_v8  ;;  %v185_v9 = vsel %vm183_vm2, %v180_v5, %v182_v8 }
  0x95   : > { %1769 = vmatprep.subr.msk.mxu0 %vm190_vm1, %v185_v9  ;;  %1845 = vmatmul.mubr.msk.f32.vlgmr.msra.gmra.mrb[0].mxu1 %vm186_vm3, %v1768_v7  ;;  %v491_v11 = vpop.permute.xlu1 %490 }
  0x96   : > { %1770 = vmatpush1.msk.msra.mxu0 %vm190_vm1, %v184_v10  ;;  %1847 = vmatprep.subr.mxu1 %v2038_v0  ;;  %v497_v17 = vsel %vm496_vm4, %v491_v11, %v493_v6 }
  0x97   : > { %1771 = vmatmul.mubr.msk.f32.vlgmr.msra.gmra.mrb[0].mxu0 %vm186_vm3, %v1768_v7  ;;  %1774 = vmatprep.subr.msk.mxu0 %vm190_vm1, %v176_v2  ;;  %v495_v12 = vpop.permute.xlu0 %494 }
  0x98   : > { %1775 = vmatpush1.msk.msra.mxu0 %vm190_vm1, %v169_v1  ;;  %1848 = vmatpush3.msk.msra.mxu1 %vm190_vm1, %v170_v3  ;;  %v498_v13 = vsel %vm496_vm4, %v493_v6, %v495_v12 }
  0x99   : > { %1849 = vmatprep.mubr.msk.f32.mxu1 %vm2039_vm0, %v2038_v0  ;;  %1780 = vmatprep.subr.msk.mxu0 %vm190_vm1, %v498_v13  ;;  %v659_v16 = vpop.permute.xlu1 %658 }
  0x9a   : > { %1852 = vmatprep.subr.mxu1 %v2038_v0  ;;  %411 = vmatprep.mubr.f32.mxu0 %v2038_v0 }
  0x9b   : > { %v657_v15 = vpop.permute.xlu0 %656 }
  0x9c   : > { %v662_v18 = vsel %vm660_vm5, %v657_v15, %v659_v16 }
  0x9d   : > { %1850 = vmatmul.mubr.msk.f32.vlgmr.msra.gmra.mrb[0].mxu1 %vm186_vm3, %v171_v14  ;;  %v821_v20 = vpop.permute.xlu1 %820 }
  0x9e   : > { %1853 = vmatpush3.msk.msra.mxu1 %vm190_vm1, %v495_v12  ;;  %1854 = vmatprep.mubr.msk.f32.mxu1 %vm2039_vm0, %v2038_v0 }
  0x9f   : > { %1776 = vmatmul.mubr.msk.f32.vlgmr.msra.gmra.mrb[0].mxu0 %vm186_vm3, %v171_v14  ;;  %v655_v19 = vpop.permute.xlu0 %654  ;;  %1857 = vmatprep.subr.mxu1 %v2038_v0 }
  0xa0   : > { %1781 = vmatpush1.msk.msra.mxu0 %vm190_vm1, %v497_v17  ;;  %572 = vmatprep.mubr.f32.mxu0 %v2038_v0  ;;  %v661_v23 = vsel %vm660_vm5, %v655_v19, %v657_v15 }
  0xa1   : > { %1786 = vmatprep.subr.msk.mxu0 %vm190_vm1, %v662_v18  ;;  %v819_v25 = vpop.permute.xlu1 %818 }
  0xa2   : > { %v825_v29 = vsel %vm824_vm6, %v819_v25, %v821_v20 }
  0xa3   : > { %v823_v22 = vpop.permute.xlu0 %822 }
  0xa4   : > { %v826_v24 = vsel %vm824_vm6, %v821_v20, %v823_v22 }
  0xa5   : > { %1855 = vmatmul.mubr.msk.f32.vlgmr.msra.gmra.mrb[0].mxu1 %vm186_vm3, %v1779_v21  ;;  %v987_v28 = vpop.permute.xlu1 %986 }
  0xa6   : > { %1858 = vmatpush3.msk.msra.mxu1 %vm190_vm1, %v659_v16  ;;  %1859 = vmatprep.mubr.msk.f32.mxu1 %vm2039_vm0, %v2038_v0 }
  0xa7   : > { %1782 = vmatmul.mubr.msk.f32.vlgmr.msra.gmra.mrb[0].mxu0 %vm186_vm3, %v1779_v21  ;;  %1862 = vmatprep.subr.mxu1 %v2038_v0  ;;  %v985_v26 = vpop.permute.xlu0 %984 }
  0xa8   : > { %1787 = vmatpush1.msk.msra.mxu0 %vm190_vm1, %v661_v23  ;;  %736 = vmatprep.mubr.f32.mxu0 %v2038_v0  ;;  %v990_v30 = vsel %vm988_vm7, %v985_v26, %v987_v28 }
  0xa9   : > { %1792 = vmatprep.subr.msk.mxu0 %vm190_vm1, %v826_v24  ;;  %v1149_v32 = vpop.permute.xlu1 %1148 }
  0xab   : > { %v983_v31 = vpop.permute.xlu0 %982 }
  0xac   : > { %v989_v35 = vsel %vm988_vm7, %v983_v31, %v985_v26 }
  0xad   : > { %1860 = vmatmul.mubr.msk.f32.vlgmr.msra.gmra.mrb[0].mxu1 %vm186_vm3, %v1785_v27  ;;  %v1147_v37 = vpop.permute.xlu1 %1146 }
  0xae   : > { %1863 = vmatpush3.msk.msra.mxu1 %vm190_vm1, %v823_v22  ;;  %1864 = vmatprep.mubr.msk.f32.mxu1 %vm2039_vm0, %v2038_v0  ;;  %v1153_v41 = vsel %vm1152_vm8, %v1147_v37, %v1149_v32 }
  0xaf   : > { %1788 = vmatmul.mubr.msk.f32.vlgmr.msra.gmra.mrb[0].mxu0 %vm186_vm3, %v1785_v27  ;;  %1867 = vmatprep.subr.mxu1 %v2038_v0  ;;  %v1151_v34 = vpop.permute.xlu0 %1150 }
  0xb0   : > { %1793 = vmatpush1.msk.msra.mxu0 %vm190_vm1, %v825_v29  ;;  %900 = vmatprep.mubr.f32.mxu0 %v2038_v0  ;;  %v1154_v36 = vsel %vm1152_vm8, %v1149_v32, %v1151_v34 }
  0xb1   : > { %1798 = vmatprep.subr.msk.mxu0 %vm190_vm1, %v990_v30  ;;  %v1315_v40 = vpop.permute.xlu1 %1314 }
  0xb3   : > { %v1313_v38 = vpop.permute.xlu0 %1312 }
  0xb4   : > { %v1318_v42 = vsel %vm1316_vm9, %v1313_v38, %v1315_v40 }
  0xb5   : > { %1865 = vmatmul.mubr.msk.f32.vlgmr.msra.gmra.mrb[0].mxu1 %vm186_vm3, %v1791_v33  ;;  %v1477_v46 = vpop.permute.xlu1 %1476 }
  0xb6   : > { %1868 = vmatpush3.msk.msra.mxu1 %vm190_vm1, %v987_v28  ;;  %1869 = vmatprep.mubr.msk.f32.mxu1 %vm2039_vm0, %v2038_v0 }
  0xb7   : > { %1794 = vmatmul.mubr.msk.f32.vlgmr.msra.gmra.mrb[0].mxu0 %vm186_vm3, %v1791_v33  ;;  %1872 = vmatprep.subr.mxu1 %v2038_v0  ;;  %v1311_v43 = vpop.permute.xlu0 %1310 }
  0xb8   : > { %1799 = vmatpush1.msk.msra.mxu0 %vm190_vm1, %v989_v35  ;;  %1064 = vmatprep.mubr.f32.mxu0 %v2038_v0  ;;  %v1317_v47 = vsel %vm1316_vm9, %v1311_v43, %v1313_v38 }
  0xb9   : > { %1804 = vmatprep.subr.msk.mxu0 %vm190_vm1, %v1154_v36  ;;  %v1475_v49 = vpop.permute.xlu1 %1474 }
  0xba   : > { %v1481_v51 = vsel %vm1480_vm10, %v1475_v49, %v1477_v46 }
  0xbb   : > { %v1479_v45 = vpop.permute.xlu0 %1478 }
  0xbc   : > { %v1482_v48 = vsel %vm1480_vm10, %v1477_v46, %v1479_v45 }
  0xbd   : > { %1870 = vmatmul.mubr.msk.f32.vlgmr.msra.gmra.mrb[0].mxu1 %vm186_vm3, %v1797_v39 }
  0xbe   : > { %1873 = vmatpush3.msk.msra.mxu1 %vm190_vm1, %v1151_v34  ;;  %1874 = vmatprep.mubr.msk.f32.mxu1 %vm2039_vm0, %v2038_v0 }
  0xbf   : > { %1800 = vmatmul.mubr.msk.f32.vlgmr.msra.gmra.mrb[0].mxu0 %vm186_vm3, %v1797_v39  ;;  %1877 = vmatprep.subr.mxu1 %v2038_v0 }
  0xc0   : > { %1805 = vmatpush1.msk.msra.mxu0 %vm190_vm1, %v1153_v41  ;;  %1228 = vmatprep.mubr.f32.mxu0 %v2038_v0 }
  0xc1   : > { %1810 = vmatprep.subr.msk.mxu0 %vm190_vm1, %v1318_v42 }
  0xc5   : > { %1875 = vmatmul.mubr.msk.f32.vlgmr.msra.gmra.mrb[0].mxu1 %vm186_vm3, %v1803_v44 }
  0xc6   : > { %1878 = vmatpush3.msk.msra.mxu1 %vm190_vm1, %v1315_v40  ;;  %1879 = vmatprep.mubr.msk.f32.mxu1 %vm2039_vm0, %v2038_v0 }
  0xc7   : > { %1806 = vmatmul.mubr.msk.f32.vlgmr.msra.gmra.mrb[0].mxu0 %vm186_vm3, %v1803_v44  ;;  %1882 = vmatprep.subr.mxu1 %v2038_v0 }
  0xc8   : > { %1811 = vmatpush1.msk.msra.mxu0 %vm190_vm1, %v1317_v47  ;;  %1392 = vmatprep.mubr.f32.mxu0 %v2038_v0 }
  0xc9   : > { %1816 = vmatprep.subr.msk.mxu0 %vm190_vm1, %v1482_v48 }
  0xcd   : > { %1880 = vmatmul.mubr.msk.f32.vlgmr.msra.gmra.mrb[0].mxu1 %vm186_vm3, %v1809_v50 }
  0xce   : > { %1883 = vmatpush3.msk.msra.mxu1 %vm190_vm1, %v1479_v45  ;;  %1884 = vmatprep.mubr.msk.f32.mxu1 %vm2039_vm0, %v2038_v0 }
  0xcf   : > { %1812 = vmatmul.mubr.msk.f32.vlgmr.msra.gmra.mrb[0].mxu0 %vm186_vm3, %v1809_v50 }
  0xd0   : > { %1817 = vmatpush1.msk.msra.mxu0 %vm190_vm1, %v1481_v51  ;;  %1556 = vmatprep.mubr.f32.mxu0 %v2038_v0 }
  0xd5   : > { %1885 = vmatmul.mubr.msk.f32.vlgmr.msra.gmra.mrb[0].mxu1 %vm186_vm3, %v1815_v52 }
  0xd7   : > { %1818 = vmatmul.mubr.msk.f32.vlgmr.msra.gmra.mrb[0].mxu0 %vm186_vm3, %v1815_v52 }
 0x1a8   : > { %v1629_v61 = vpop.f32.mrb[0].mxu1 }
 0x1a9   : > { %v1655_v63 = vmul.f32 %v1649_v59, %v1629_v61  ;;  %v1886_v0 = vpop.f32.mrb[1].mxu1 }
 0x1aa   : > { %v1558_v1 = vpop.f32.mrb[0].mxu0 }
 0x1ab   : > { %v1653_v2 = vmul.f32 %v1641_v60, %v1558_v1  ;;  %v1560_v3 = vpop.f32.mrb[1].mxu0  ;;  %v1665_v5 = vmul.f32 %v1655_v63, %v1629_v61  ;;  %v1658_v9 = vsel %vm1657_vm11, %v1655_v63, 0.0 }
 0x1ac   : > { %v1654_v4 = vmul.f32 %v1645_v62, %v1560_v3 }
 0x1ad   : > { %v1663_v6 = vmul.f32 %v1653_v2, %v1558_v1  ;;  %v1667_v12 = vsel %vm1657_vm11, %v1665_v5, 0.0 }
 0x1ae   : > { %v1664_v7 = vmul.f32 %v1654_v4, %v1560_v3  ;;  %v1656_v8 = vadd.f32 %v1654_v4, %v1653_v2 }
 0x1b0   : > { %v1659_v10 = vadd.f32 %v1658_v9, %v1656_v8  ;;  %v1666_v11 = vadd.f32 %v1664_v7, %v1663_v6 }
 0x1b2   : > { %1660 = vadd.xlane.f32.xlu0 %v1659_v10  ;;  %v1668_v13 = vadd.f32 %v1667_v12, %v1666_v11 }
 0x1b4   : > { %1669 = vadd.xlane.f32.xlu1 %v1668_v13 }
 0x23f   : > { %v1661_v14 = vpop.xlane.xlu0 %1660 }
 0x240   : > { %v1662_v15 = vmul.f32 0.00390625, %v1661_v14 }
 0x241   : > { %v1670_v16 = vpop.xlane.xlu1 %1669 }
 0x242   : > { %v1671_v17 = vmul.f32 0.00390625, %v1670_v16  ;;  %v1672_v18 = vmul.f32 %v1662_v15, %v1662_v15  ;;  %v1675_v22 = vsub.f32 %v1558_v1, %v1662_v15  ;;  %v1676_v23 = vsub.f32 %v1560_v3, %v1662_v15 }
 0x243   : > { %v1677_v24 = vsub.f32 %v1629_v61, %v1662_v15 }
 0x244   : > { %v1673_v19 = vsub.f32 %v1671_v17, %v1672_v18 }
 0x246   : > { %v1674_v20 = vmax.f32 %v1673_v19, 0.0 }
 0x248   : > { %v1678_v21 = vadd.f32 1e-05, %v1674_v20 }
 0x24a   : > { %1972 = vrsqrt.f32 %v1678_v21 }
 0x254   : > { %v1973_v25 = vpop.eup %1972 }
 0x255   : > { %v1680_v26 = vmul.f32 %v1973_v25, %v1675_v22  ;;  %v1681_v27 = vmul.f32 %v1973_v25, %v1676_v23  ;;  %v1682_v28 = vmul.f32 %v1973_v25, %v1677_v24 }
 0x257   : > { %v1683_v29 = vmax.f32 %v1680_v26, 0.0  ;;  %v1684_v30 = vmax.f32 %v1681_v27, 0.0  ;;  %v1685_v31 = vmax.f32 %v1682_v28, 0.0 }
 0x259   : > { %1686 = vst [vmem:[%s163_s24] sm:$0xff] %v1683_v29  ;;  %1687 = vst [vmem:[%s163_s24 + $0x8] sm:$0xff] %v1684_v30 }
 0x25a   : > { %1688 = vst.msk [vmem:[%s163_s24 + $0x10] sm:$0xff] %vm1657_vm11, %v1685_v31 }
 0x25b   : > { %1987 = shalt.err (!%p1984_p3)
}
 0x25c   : > { %s1988_s6 = scalar_lea.hbm %s2252_s28, 384  ;;  %s1992_s9 = scalar_lea.hbm %s2298_s3, 768 }
 0x25d   : > { %p1989_p4 = scmp.ne.s32.totalorder %s2252_s28, %s1988_s6  ;;  %p1993_p9 = scmp.lt.u32.totalorder %s2252_s28, %s2298_s3 }
 0x25e   : > { %p1994_p10 = scmp.lt.u32.totalorder %s1992_s9, %s1988_s6  ;;  %p1996_p12 = scmp.lt.u32.totalorder %s1988_s6, %s2252_s28 }
 0x25f   : > { %p1990_p7 = pnand %p1989_p4, %p2107_p5 }
 0x260   : > { %p1995_p11 = por %p1994_p10, %p1993_p9 }
 0x261   : > { %p1991_p8 = pneg %p1990_p7 }
 0x262   : > { %p1997_p13 = por %p1996_p12, %p1995_p11 }
 0x264   : > { %p1998_p0 = pnand %p1997_p13, %p1991_p8 }
 0x266   : > { %2001 = shalt.err (!%p1998_p0)
}
 0x267   : > { %1922 = dma.vmem_to_hbm [thread:$0]  (%p2107_p5), %s2254_s25, 384, %s2252_s28, %s1690_s16  }
 0x268 PF: > { %p1928_p1 = scmp.ge.s32.totalorder %s2036_s15, 2  ;;  %s1716_s17 = sand.u32 1, %s2024_s12  }
 0x269   : > { %s1717_s19 = scalar_lea.sflag [#allocation3], %s1716_s17 }
 0x26a   : > { %p1925_p2 = pnand %p1928_p1, %p2111_p6 }
 0x26c   : > { %2019 = dma.done.wait (!%p1925_p2), %s1717_s19, 384  }
 0x26d   : > { %2021 = vsyncadd (!%p1925_p2), %s1717_s19, 4294966912  ;;  %p13_p3 = scmp.ge.s32.totalorder %s2094_s18, 4   ;;  %s2301_s12 = smov %s2028_s13 }
 0x26e   : > { %s2302_s13 = smov %s2032_s14  ;;  %s2303_s14 = smov %s2105_s21 }
 0x26f   : > { %s2304_s15 = smov %s2094_s18  ;;  %15 = sbr.rel (!%p13_p3) target bundleno = 3 (0x3), region = 75 }
 0x276   :  { %1722 = vsyncpa [#allocation3], 1 }
 0x277   :  { %1724 = vsyncpa [#allocation3 + $0x1], 1 }

</bundles_post_ra>
